<compile_context>
chip_gen: v6e
topology: v6e:2x2x1
jax: 0.10.0
libtpu: 0.0.40
codegen_flags: <defaults>
</compile_context>

<pallas_src>
import functools

import jax
import jax.numpy as jnp
from jax import lax
from jax.experimental import pallas as pl
from jax.experimental.pallas import tpu as pltpu


_VMEM_TILE_BUDGET = 8 << 20  # conservative per-step tile budget (fits v7x defaults)


# ----------------------------- Pallas kernel --------------------------------

def _conv3x3_bn_relu_kernel(x_ref, halo_ref, w_ref, scale_ref, shift_ref,
                            o_ref, xw_ref, rhs_ref, *, W, RB, C_in, C_out):
    """One (batch, row-block) step of fused 3x3 'same' conv + scale/shift + ReLU.

    x_ref:     (1, C_in, RB*W)      f32  row block, flat spatial axis on lanes
    halo_ref:  (1, 1, 2*C_in, W)    f32  [row above; row below] (zeros at borders)
    w_ref:     (C_out_pad, 9*C_in)  bf16 weights, K = tap-major / C_in-minor
    scale_ref: (C_out_pad, 1)       f32  folded BN scale (or 1)
    shift_ref: (C_out_pad, 1)       f32  folded BN shift (or conv bias)
    o_ref:     (1, C_out, RB*W)     f32  output row block, lane-dense stores
    xw_ref:    (C_in, (RB+4)*W)     f32  scratch: halo-padded window (+W margins)
    rhs_ref:   (9*C_in, RB*W)       f32  scratch: stacked im2col RHS for one dot
    """
    RBW = RB * W

    # Assemble the (RB+2)-row padded window in VMEM.  The W-wide margins at both
    # ends are only ever read at column-masked positions, so they stay untouched.
    xw_ref[:, W:2 * W] = halo_ref[0, 0, 0:C_in, :]                    # padded row 0
    xw_ref[:, 2 * W:(RB + 2) * W] = x_ref[0]                          # rows 1..RB
    xw_ref[:, (RB + 2) * W:(RB + 3) * W] = halo_ref[0, 0, C_in:2 * C_in, :]

    # Column-validity masks for the left/right taps ('same' padding along x).
    col = lax.broadcasted_iota(jnp.int32, (1, RBW), 1) % W
    col_masks = (col >= 1, None, col <= W - 2)                        # dj = 0, 1, 2

    # Build the stacked im2col RHS: rows [t*C_in, (t+1)*C_in) hold tap t=(di,dj).
    for di in range(3):
        for dj in range(3):
            t = di * 3 + dj
            s = (di + 1) * W + (dj - 1)                               # static offset
            raw = xw_ref[:, s:s + RBW]                                # (C_in, RBW)
            tap = raw if col_masks[dj] is None else jnp.where(col_masks[dj], raw, 0.0)
            rhs_ref[t * C_in:(t + 1) * C_in, :] = tap

    # Single K = 9*C_in MXU dot, accumulator is (C_out_pad, RBW) in f32: no result
    # transpose, no wasted output lanes, tiny vreg footprint.
    rhs = rhs_ref[...].astype(w_ref.dtype)
    acc = jnp.dot(w_ref[...], rhs, preferred_element_type=jnp.float32)

    y = jnp.maximum(acc * scale_ref[...] + shift_ref[...], 0.0)       # BN/bias + ReLU
    o_ref[0] = y[:C_out].astype(o_ref.dtype)


# ------------------------------- wrapper -------------------------------------

def _pick_row_block(H, W, C_in, C_out):
    """Largest divisor RB of H whose row-block working set fits the VMEM budget.

    Legality: RB*W must be a multiple of 128 lanes (or RB == H, i.e. the whole
    image) so the flat BlockSpec trailing dim obeys the (8,128) rule.
    """
    legal = [rb for rb in range(1, H + 1)
             if H % rb == 0 and (rb * W) % 128 == 0]
    if not legal:
        legal = [H]

    def tile_bytes(rb):
        rbw = rb * W
        return (4 * rbw * (2 * C_in + 2 * C_out + 9 * C_in)
                + 4 * C_in * (rb + 4) * W)

    fitting = [rb for rb in legal if tile_bytes(rb) <= _VMEM_TILE_BUDGET]
    return max(fitting) if fitting else min(legal)


def conv3x3_bn_relu(x_nchw, w_oihw, scale, shift, *, row_block=None):
    """Conv2d(k=3, pad=1, stride=1) + folded BN / conv bias + ReLU.  NCHW in/out."""
    B, C_in, H, W = x_nchw.shape
    C_out = w_oihw.shape[0]
    C_out_pad = 8 * pl.cdiv(C_out, 8)
    K9 = 9 * C_in

    RB = _pick_row_block(H, W, C_in, C_out) if row_block is None else row_block
    assert H % RB == 0 and ((RB * W) % 128 == 0 or RB == H)
    n_rb = H // RB
    RBW = RB * W

    x = x_nchw.astype(jnp.float32)
    x_flat = x.reshape(B, C_in, H * W)          # free reshape: spatial axis on lanes

    # Halo rows per row block (zeros at the image borders).  Only ~2/RB of the
    # input is re-read here; there is no full-activation transpose/pad round trip.
    zrow = jnp.zeros((B, C_in, 1, W), jnp.float32)
    if n_rb > 1:
        top = jnp.concatenate([zrow, x[:, :, RB - 1:H - 1:RB, :]], axis=2)
        bot = jnp.concatenate([x[:, :, RB:H:RB, :], zrow], axis=2)
    else:
        top, bot = zrow, zrow
    halo = jnp.transpose(jnp.concatenate([top, bot], axis=1), (0, 2, 1, 3))
    # halo: (B, n_rb, 2*C_in, W); [:, r, :C_in] = row above block r, [:, r, C_in:] below.

    # Weights: (O, I, 3, 3) -> (C_out_pad, 9*C_in), K tap-major / C_in-minor to
    # match the stacked RHS the kernel builds.  bf16 operands, f32 accumulate.
    w = jnp.transpose(w_oihw, (0, 2, 3, 1)).reshape(C_out, K9)
    w = jnp.pad(w, ((0, C_out_pad - C_out), (0, 0))).astype(jnp.bfloat16)
    scale_p = jnp.pad(scale.astype(jnp.float32).reshape(C_out, 1),
                      ((0, C_out_pad - C_out), (0, 0)))
    shift_p = jnp.pad(shift.astype(jnp.float32).reshape(C_out, 1),
                      ((0, C_out_pad - C_out), (0, 0)))

    kernel = functools.partial(_conv3x3_bn_relu_kernel,
                               W=W, RB=RB, C_in=C_in, C_out=C_out)
    out = pl.pallas_call(
        kernel,
        # TODO(synk): output could be emitted as bf16 (half the writeback) if the
        # downstream decoder layer accepts it; kept f32 to match the module.
        out_shape=jax.ShapeDtypeStruct((B, C_out, H * W), jnp.float32),
        grid_spec=pltpu.PrefetchScalarGridSpec(
            num_scalar_prefetch=0,
            grid=(B, n_rb),
            in_specs=[
                pl.BlockSpec((1, C_in, RBW), lambda b, r: (b, 0, r)),
                pl.BlockSpec((1, 1, 2 * C_in, W), lambda b, r: (b, r, 0, 0)),
                pl.BlockSpec((C_out_pad, K9), lambda b, r: (0, 0)),   # resident
                pl.BlockSpec((C_out_pad, 1), lambda b, r: (0, 0)),    # resident
                pl.BlockSpec((C_out_pad, 1), lambda b, r: (0, 0)),    # resident
            ],
            out_specs=pl.BlockSpec((1, C_out, RBW), lambda b, r: (b, 0, r)),
            scratch_shapes=[
                pltpu.VMEM((C_in, (RB + 4) * W), jnp.float32),        # padded window
                pltpu.VMEM((K9, RBW), jnp.float32),                   # im2col RHS
            ],
        ),
        compiler_params=pltpu.CompilerParams(
            # batch and row-block steps are independent -> megacore-shardable.
            dimension_semantics=("parallel", "parallel"),
        ),
    )(x_flat, halo, w, scale_p, shift_p)

    return out.reshape(B, C_out, H, W)          # free reshape; no output transpose


# ------------------------------- module --------------------------------------

class Conv2dReLUPallas:
    """forward(x) = ReLU(BatchNorm(Conv2d(x)))   (or ReLU(Conv2d(x) + bias))."""

    def __init__(self, in_channels, out_channels, kernel_size=3, padding=1,
                 stride=1, use_batchnorm=True, *, key, eps=1e-5):
        # TODO(synk): only the kernel_size=3 / padding=1 / stride=1 configuration
        # (the one the SMP decoders use) is implemented as a Pallas kernel.
        assert kernel_size == 3 and padding == 1 and stride == 1

        std = (2.0 / (out_channels * kernel_size * kernel_size)) ** 0.5
        self.weight = jax.random.normal(
            key, (out_channels, in_channels, 3, 3), jnp.float32) * std

        if use_batchnorm:
            # eval-mode BatchNorm2d folded into a per-channel scale/shift.
            gamma = jnp.ones((out_channels,), jnp.float32)
            beta = jnp.zeros((out_channels,), jnp.float32)
            running_mean = jnp.zeros((out_channels,), jnp.float32)
            running_var = jnp.ones((out_channels,), jnp.float32)
            self.scale = gamma * jax.lax.rsqrt(running_var + eps)
            self.shift = beta - running_mean * self.scale
            # TODO(synk): training-mode BatchNorm (batch statistics) not implemented.
        else:
            bias = jnp.zeros((out_channels,), jnp.float32)            # conv bias
            self.scale = jnp.ones((out_channels,), jnp.float32)
            self.shift = bias

        self._fwd = jax.jit(conv3x3_bn_relu)

    def forward(self, x_nchw):
        return self._fwd(x_nchw, self.weight, self.scale, self.shift)


# --------------------------------- main ---------------------------------------

if __name__ == "__main__":
    key = jax.random.PRNGKey(0)
    k_x, k_w = jax.random.split(key)

    B, C_in, H, W = 2, 4, 16, 16
    C_out = 8

    x = jax.random.normal(k_x, (B, C_in, H, W), jnp.float32)
    block = Conv2dReLUPallas(C_in, C_out, kernel_size=3, padding=1, stride=1,
                             use_batchnorm=True, key=k_w)

    y = jax.block_until_ready(block.forward(x))
    assert y.shape == (B, C_out, H, W)
    assert bool(jnp.all(jnp.isfinite(y))) and bool(jnp.all(y >= 0.0))

    # Reference: f32 XLA conv + folded BN + ReLU.
    conv_ref = jax.lax.conv_general_dilated(
        x, block.weight, window_strides=(1, 1), padding=((1, 1), (1, 1)),
        dimension_numbers=("NCHW", "OIHW", "NCHW"))
    y_ref = jnp.maximum(conv_ref * block.scale[None, :, None, None]
                        + block.shift[None, :, None, None], 0.0)
    assert float(jnp.max(jnp.abs(y - y_ref))) < 5e-2

    # Also exercise the halo'd row-block tiling path (grid = (B, H // row_block)).
    tiled = jax.jit(functools.partial(conv3x3_bn_relu, row_block=8))
    y_tiled = jax.block_until_ready(tiled(x, block.weight, block.scale, block.shift))
    assert float(jnp.max(jnp.abs(y_tiled - y_ref))) < 5e-2

    print("KERNEL_OK")
</pallas_src>

<mosaic_0001>
module attributes {stable_mosaic.version = 11 : i64} {
  func.func @_conv3x3_bn_relu_kernel(%arg0: i32, %arg1: i32, %arg2: memref<1x4x256xf32, #tpu.memory_space<vmem>>, %arg3: memref<1x1x8x16xf32, #tpu.memory_space<vmem>>, %arg4: memref<8x36xbf16, #tpu.memory_space<vmem>>, %arg5: memref<8x1xf32, #tpu.memory_space<vmem>>, %arg6: memref<8x1xf32, #tpu.memory_space<vmem>>, %arg7: memref<1x8x256xf32, #tpu.memory_space<vmem>>, %arg8: memref<4x320xf32, #tpu.memory_space<vmem>>, %arg9: memref<36x256xf32, #tpu.memory_space<vmem>>) attributes {dimension_semantics = [#tpu.dimension_semantics<parallel>, #tpu.dimension_semantics<parallel>], iteration_bounds = array<i64: 2, 1>, scalar_prefetch = 0 : i64, scratch_operands = 2 : i64, tpu.core_type = #tpu.core_type<tc>, window_params = [{transform_indices = @transform_0, window_bounds = array<i64: 1, 4, 256>}, {transform_indices = @transform_1, window_bounds = array<i64: 1, 1, 8, 16>}, {pipeline_mode = #tpu.pipeline_mode<synchronous>, transform_indices = @transform_2, window_bounds = array<i64: 8, 36>}, {pipeline_mode = #tpu.pipeline_mode<synchronous>, transform_indices = @transform_3, window_bounds = array<i64: 8, 1>}, {pipeline_mode = #tpu.pipeline_mode<synchronous>, transform_indices = @transform_4, window_bounds = array<i64: 8, 1>}, {transform_indices = @transform_5, window_bounds = array<i64: 1, 8, 256>}]} {
    %c0 = arith.constant 0 : index
    %c0_0 = arith.constant 0 : index
    %c0_1 = arith.constant 0 : index
    %c0_2 = arith.constant 0 : index
    %0 = vector.load %arg3[%c0, %c0_0, %c0_1, %c0_2] : memref<1x1x8x16xf32, #tpu.memory_space<vmem>>, vector<1x1x4x16xf32>
    %1 = vector.shape_cast %0 : vector<1x1x4x16xf32> to vector<4x16xf32>
    %c0_3 = arith.constant 0 : index
    %c16 = arith.constant 16 : index
    %2 = vector.load %arg8[%c0_3, %c16] : memref<4x320xf32, #tpu.memory_space<vmem>>, vector<4x16xf32>
    tpu.vector_store %arg8[%c0_3, %c16], %1 {strides = array<i32>} : memref<4x320xf32, #tpu.memory_space<vmem>>, vector<4x16xf32>,
    %c0_4 = arith.constant 0 : index
    %c0_5 = arith.constant 0 : index
    %c0_6 = arith.constant 0 : index
    %3 = vector.load %arg2[%c0_4, %c0_5, %c0_6] : memref<1x4x256xf32, #tpu.memory_space<vmem>>, vector<1x4x256xf32>
    %4 = vector.shape_cast %3 : vector<1x4x256xf32> to vector<4x256xf32>
    %c0_7 = arith.constant 0 : index
    %c32 = arith.constant 32 : index
    %5 = vector.load %arg8[%c0_7, %c32] : memref<4x320xf32, #tpu.memory_space<vmem>>, vector<4x256xf32>
    tpu.vector_store %arg8[%c0_7, %c32], %4 {strides = array<i32>} : memref<4x320xf32, #tpu.memory_space<vmem>>, vector<4x256xf32>,
    %c0_8 = arith.constant 0 : index
    %c0_9 = arith.constant 0 : index
    %c4 = arith.constant 4 : index
    %c0_10 = arith.constant 0 : index
    %6 = vector.load %arg3[%c0_8, %c0_9, %c4, %c0_10] : memref<1x1x8x16xf32, #tpu.memory_space<vmem>>, vector<1x1x4x16xf32>
    %7 = vector.shape_cast %6 : vector<1x1x4x16xf32> to vector<4x16xf32>
    %c0_11 = arith.constant 0 : index
    %c288 = arith.constant 288 : index
    %8 = vector.load %arg8[%c0_11, %c288] : memref<4x320xf32, #tpu.memory_space<vmem>>, vector<4x16xf32>
    tpu.vector_store %arg8[%c0_11, %c288], %7 {strides = array<i32>} : memref<4x320xf32, #tpu.memory_space<vmem>>, vector<4x16xf32>,
    %9 = tpu.iota {dimensions = array<i32: 1>} : vector<1x256xi32>
    %c16_i32 = arith.constant 16 : i32
    %c0_i32 = arith.constant 0 : i32
    %10 = arith.cmpi eq, %c16_i32, %c0_i32 : i32
    %c1_i32 = arith.constant 1 : i32
    %11 = arith.select %10, %c1_i32, %c16_i32 : i32
    %12 = vector.broadcast %11 : i32 to vector<1x256xi32>
    %13 = arith.remsi %9, %12 : vector<1x256xi32>
    %c0_i32_12 = arith.constant 0 : i32
    %14 = vector.broadcast %c0_i32_12 : i32 to vector<1x256xi32>
    %15 = arith.cmpi ne, %13, %14 : vector<1x256xi32>
    %c0_i32_13 = arith.constant 0 : i32
    %16 = vector.broadcast %c0_i32_13 : i32 to vector<1x256xi32>
    %17 = arith.cmpi slt, %13, %16 : vector<1x256xi32>
    %c0_i32_14 = arith.constant 0 : i32
    %18 = arith.cmpi slt, %11, %c0_i32_14 : i32
    %19 = vector.broadcast %18 : i1 to vector<1x256xi1>
    %20 = vector.broadcast %19 : vector<1x256xi1> to vector<1x256xi1>
    %21 = arith.xori %17, %20 : vector<1x256xi1>
    %22 = arith.andi %21, %15 : vector<1x256xi1>
    %23 = vector.broadcast %11 : i32 to vector<1x256xi32>
    %24 = arith.addi %13, %23 : vector<1x256xi32>
    %25 = arith.select %22, %24, %13 : vector<1x256xi1>, vector<1x256xi32>
    %c1_i32_15 = arith.constant 1 : i32
    %26 = vector.broadcast %c1_i32_15 : i32 to vector<1x256xi32>
    %27 = arith.cmpi sge, %25, %26 : vector<1x256xi32>
    %c14_i32 = arith.constant 14 : i32
    %28 = vector.broadcast %c14_i32 : i32 to vector<1x256xi32>
    %29 = arith.cmpi sle, %25, %28 : vector<1x256xi32>
    %c0_16 = arith.constant 0 : index
    %c15 = arith.constant 15 : index
    %30 = vector.load %arg8[%c0_16, %c15] : memref<4x320xf32, #tpu.memory_space<vmem>>, vector<4x256xf32>
    %cst = arith.constant 0.000000e+00 : f32
    %31 = vector.shape_cast %27 : vector<1x256xi1> to vector<1x256xi1>
    %32 = vector.broadcast %31 : vector<1x256xi1> to vector<4x256xi1>
    %33 = vector.broadcast %cst : f32 to vector<4x256xf32>
    %34 = arith.select %32, %30, %33 : vector<4x256xi1>, vector<4x256xf32>
    %c0_17 = arith.constant 0 : index
    %c0_18 = arith.constant 0 : index
    %35 = vector.load %arg9[%c0_17, %c0_18] : memref<36x256xf32, #tpu.memory_space<vmem>>, vector<4x256xf32>
    tpu.vector_store %arg9[%c0_17, %c0_18], %34 {strides = array<i32>} : memref<36x256xf32, #tpu.memory_space<vmem>>, vector<4x256xf32>,
    %c0_19 = arith.constant 0 : index
    %c16_20 = arith.constant 16 : index
    %36 = vector.load %arg8[%c0_19, %c16_20] : memref<4x320xf32, #tpu.memory_space<vmem>>, vector<4x256xf32>
    %c4_21 = arith.constant 4 : index
    %c0_22 = arith.constant 0 : index
    %37 = vector.load %arg9[%c4_21, %c0_22] : memref<36x256xf32, #tpu.memory_space<vmem>>, vector<4x256xf32>
    tpu.vector_store %arg9[%c4_21, %c0_22], %36 {strides = array<i32>} : memref<36x256xf32, #tpu.memory_space<vmem>>, vector<4x256xf32>,
    %c0_23 = arith.constant 0 : index
    %c17 = arith.constant 17 : index
    %38 = vector.load %arg8[%c0_23, %c17] : memref<4x320xf32, #tpu.memory_space<vmem>>, vector<4x256xf32>
    %cst_24 = arith.constant 0.000000e+00 : f32
    %39 = vector.shape_cast %29 : vector<1x256xi1> to vector<1x256xi1>
    %40 = vector.broadcast %39 : vector<1x256xi1> to vector<4x256xi1>
    %41 = vector.broadcast %cst_24 : f32 to vector<4x256xf32>
    %42 = arith.select %40, %38, %41 : vector<4x256xi1>, vector<4x256xf32>
    %c8 = arith.constant 8 : index
    %c0_25 = arith.constant 0 : index
    %43 = vector.load %arg9[%c8, %c0_25] : memref<36x256xf32, #tpu.memory_space<vmem>>, vector<4x256xf32>
    tpu.vector_store %arg9[%c8, %c0_25], %42 {strides = array<i32>} : memref<36x256xf32, #tpu.memory_space<vmem>>, vector<4x256xf32>,
    %c0_26 = arith.constant 0 : index
    %c31 = arith.constant 31 : index
    %44 = vector.load %arg8[%c0_26, %c31] : memref<4x320xf32, #tpu.memory_space<vmem>>, vector<4x256xf32>
    %cst_27 = arith.constant 0.000000e+00 : f32
    %45 = vector.shape_cast %27 : vector<1x256xi1> to vector<1x256xi1>
    %46 = vector.broadcast %45 : vector<1x256xi1> to vector<4x256xi1>
    %47 = vector.broadcast %cst_27 : f32 to vector<4x256xf32>
    %48 = arith.select %46, %44, %47 : vector<4x256xi1>, vector<4x256xf32>
    %c12 = arith.constant 12 : index
    %c0_28 = arith.constant 0 : index
    %49 = vector.load %arg9[%c12, %c0_28] : memref<36x256xf32, #tpu.memory_space<vmem>>, vector<4x256xf32>
    tpu.vector_store %arg9[%c12, %c0_28], %48 {strides = array<i32>} : memref<36x256xf32, #tpu.memory_space<vmem>>, vector<4x256xf32>,
    %c0_29 = arith.constant 0 : index
    %c32_30 = arith.constant 32 : index
    %50 = vector.load %arg8[%c0_29, %c32_30] : memref<4x320xf32, #tpu.memory_space<vmem>>, vector<4x256xf32>
    %c16_31 = arith.constant 16 : index
    %c0_32 = arith.constant 0 : index
    %51 = vector.load %arg9[%c16_31, %c0_32] : memref<36x256xf32, #tpu.memory_space<vmem>>, vector<4x256xf32>
    tpu.vector_store %arg9[%c16_31, %c0_32], %50 {strides = array<i32>} : memref<36x256xf32, #tpu.memory_space<vmem>>, vector<4x256xf32>,
    %c0_33 = arith.constant 0 : index
    %c33 = arith.constant 33 : index
    %52 = vector.load %arg8[%c0_33, %c33] : memref<4x320xf32, #tpu.memory_space<vmem>>, vector<4x256xf32>
    %cst_34 = arith.constant 0.000000e+00 : f32
    %53 = vector.shape_cast %29 : vector<1x256xi1> to vector<1x256xi1>
    %54 = vector.broadcast %53 : vector<1x256xi1> to vector<4x256xi1>
    %55 = vector.broadcast %cst_34 : f32 to vector<4x256xf32>
    %56 = arith.select %54, %52, %55 : vector<4x256xi1>, vector<4x256xf32>
    %c20 = arith.constant 20 : index
    %c0_35 = arith.constant 0 : index
    %57 = vector.load %arg9[%c20, %c0_35] : memref<36x256xf32, #tpu.memory_space<vmem>>, vector<4x256xf32>
    tpu.vector_store %arg9[%c20, %c0_35], %56 {strides = array<i32>} : memref<36x256xf32, #tpu.memory_space<vmem>>, vector<4x256xf32>,
    %c0_36 = arith.constant 0 : index
    %c47 = arith.constant 47 : index
    %58 = vector.load %arg8[%c0_36, %c47] : memref<4x320xf32, #tpu.memory_space<vmem>>, vector<4x256xf32>
    %cst_37 = arith.constant 0.000000e+00 : f32
    %59 = vector.shape_cast %27 : vector<1x256xi1> to vector<1x256xi1>
    %60 = vector.broadcast %59 : vector<1x256xi1> to vector<4x256xi1>
    %61 = vector.broadcast %cst_37 : f32 to vector<4x256xf32>
    %62 = arith.select %60, %58, %61 : vector<4x256xi1>, vector<4x256xf32>
    %c24 = arith.constant 24 : index
    %c0_38 = arith.constant 0 : index
    %63 = vector.load %arg9[%c24, %c0_38] : memref<36x256xf32, #tpu.memory_space<vmem>>, vector<4x256xf32>
    tpu.vector_store %arg9[%c24, %c0_38], %62 {strides = array<i32>} : memref<36x256xf32, #tpu.memory_space<vmem>>, vector<4x256xf32>,
    %c0_39 = arith.constant 0 : index
    %c48 = arith.constant 48 : index
    %64 = vector.load %arg8[%c0_39, %c48] : memref<4x320xf32, #tpu.memory_space<vmem>>, vector<4x256xf32>
    %c28 = arith.constant 28 : index
    %c0_40 = arith.constant 0 : index
    %65 = vector.load %arg9[%c28, %c0_40] : memref<36x256xf32, #tpu.memory_space<vmem>>, vector<4x256xf32>
    tpu.vector_store %arg9[%c28, %c0_40], %64 {strides = array<i32>} : memref<36x256xf32, #tpu.memory_space<vmem>>, vector<4x256xf32>,
    %c0_41 = arith.constant 0 : index
    %c49 = arith.constant 49 : index
    %66 = vector.load %arg8[%c0_41, %c49] : memref<4x320xf32, #tpu.memory_space<vmem>>, vector<4x256xf32>
    %cst_42 = arith.constant 0.000000e+00 : f32
    %67 = vector.shape_cast %29 : vector<1x256xi1> to vector<1x256xi1>
    %68 = vector.broadcast %67 : vector<1x256xi1> to vector<4x256xi1>
    %69 = vector.broadcast %cst_42 : f32 to vector<4x256xf32>
    %70 = arith.select %68, %66, %69 : vector<4x256xi1>, vector<4x256xf32>
    %c32_43 = arith.constant 32 : index
    %c0_44 = arith.constant 0 : index
    %71 = vector.load %arg9[%c32_43, %c0_44] : memref<36x256xf32, #tpu.memory_space<vmem>>, vector<4x256xf32>
    tpu.vector_store %arg9[%c32_43, %c0_44], %70 {strides = array<i32>} : memref<36x256xf32, #tpu.memory_space<vmem>>, vector<4x256xf32>,
    %c0_45 = arith.constant 0 : index
    %c0_46 = arith.constant 0 : index
    %72 = vector.load %arg9[%c0_45, %c0_46] : memref<36x256xf32, #tpu.memory_space<vmem>>, vector<36x256xf32>
    %73 = arith.truncf %72 : vector<36x256xf32> to vector<36x256xbf16>
    %c0_47 = arith.constant 0 : index
    %c0_48 = arith.constant 0 : index
    %74 = vector.load %arg4[%c0_47, %c0_48] : memref<8x36xbf16, #tpu.memory_space<vmem>>, vector<8x36xbf16>
    %cst_49 = arith.constant dense<0.000000e+00> : vector<8x256xf32>
    %75 = tpu.matmul %74, %73, %cst_49 {dimension_numbers = #tpu.dot_dimension_numbers<[1], [0], [0], [1], [0, 0, 1, 1], [], []>} : vector<8x36xbf16>, vector<36x256xbf16>, vector<8x256xf32> -> vector<8x256xf32>
    %c0_50 = arith.constant 0 : index
    %c0_51 = arith.constant 0 : index
    %76 = vector.load %arg5[%c0_50, %c0_51] : memref<8x1xf32, #tpu.memory_space<vmem>>, vector<8x1xf32>
    %77 = vector.broadcast %76 : vector<8x1xf32> to vector<8x256xf32>
    %78 = arith.mulf %75, %77 : vector<8x256xf32>
    %c0_52 = arith.constant 0 : index
    %c0_53 = arith.constant 0 : index
    %79 = vector.load %arg6[%c0_52, %c0_53] : memref<8x1xf32, #tpu.memory_space<vmem>>, vector<8x1xf32>
    %80 = vector.broadcast %79 : vector<8x1xf32> to vector<8x256xf32>
    %81 = arith.addf %78, %80 : vector<8x256xf32>
    %cst_54 = arith.constant 0.000000e+00 : f32
    %82 = vector.broadcast %cst_54 : f32 to vector<8x256xf32>
    %83 = arith.maximumf %81, %82 : vector<8x256xf32>
    %c0_55 = arith.constant 0 : index
    %c0_56 = arith.constant 0 : index
    %c0_57 = arith.constant 0 : index
    %84 = vector.load %arg7[%c0_55, %c0_56, %c0_57] : memref<1x8x256xf32, #tpu.memory_space<vmem>>, vector<1x8x256xf32>
    %85 = vector.shape_cast %84 : vector<1x8x256xf32> to vector<8x256xf32>
    %86 = vector.shape_cast %83 : vector<8x256xf32> to vector<1x8x256xf32>
    tpu.vector_store %arg7[%c0_55, %c0_56, %c0_57], %86 {strides = array<i32>} : memref<1x8x256xf32, #tpu.memory_space<vmem>>, vector<1x8x256xf32>,
    return
  }
  func.func @transform_0(%arg0: i32, %arg1: i32) -> (i32, i32, i32) {
    %c0_i32 = arith.constant 0 : i32
    %c0_i32_0 = arith.constant 0 : i32
    return %arg0, %c0_i32, %arg1 : i32, i32, i32
  }
  func.func @transform_1(%arg0: i32, %arg1: i32) -> (i32, i32, i32, i32) {
    %c0_i32 = arith.constant 0 : i32
    %c0_i32_0 = arith.constant 0 : i32
    %c0_i32_1 = arith.constant 0 : i32
    return %arg0, %arg1, %c0_i32, %c0_i32_0 : i32, i32, i32, i32
  }
  func.func @transform_2(%arg0: i32, %arg1: i32) -> (i32, i32) {
    %c0_i32 = arith.constant 0 : i32
    %c0_i32_0 = arith.constant 0 : i32
    %c0_i32_1 = arith.constant 0 : i32
    return %c0_i32, %c0_i32_0 : i32, i32
  }
  func.func @transform_3(%arg0: i32, %arg1: i32) -> (i32, i32) {
    %c0_i32 = arith.constant 0 : i32
    %c0_i32_0 = arith.constant 0 : i32
    %c0_i32_1 = arith.constant 0 : i32
    return %c0_i32, %c0_i32_0 : i32, i32
  }
  func.func @transform_4(%arg0: i32, %arg1: i32) -> (i32, i32) {
    %c0_i32 = arith.constant 0 : i32
    %c0_i32_0 = arith.constant 0 : i32
    %c0_i32_1 = arith.constant 0 : i32
    return %c0_i32, %c0_i32_0 : i32, i32
  }
  func.func @transform_5(%arg0: i32, %arg1: i32) -> (i32, i32, i32) {
    %c0_i32 = arith.constant 0 : i32
    %c0_i32_0 = arith.constant 0 : i32
    return %arg0, %c0_i32, %arg1 : i32, i32, i32
  }
}

</mosaic_0001>

<bundles_post_ra>
// kernel: conv3x3_bn_relu.1
= control target key start
LH: loop header
LB: loop body
LE: loop exit
PB: predicated region body
PF: predicated region fallthrough
CT: control target
= control target key end

     0   :  { %s864_s18 = smov 0   ;;  %s866_s19 = smov 0   ;;  %s974_s0 = inlined_call_operand.vmem [shape: f32[2,4,256], index: 0, kind: input, shape index: {}]   ;;  %s975_s1 = inlined_call_operand.vmem [shape: f32[2,1,8,16], index: 1, kind: input, shape index: {}]   ;;  %s976_s2 = inlined_call_operand.vmem [shape: bf16[8,36], index: 2, kind: input, shape index: {}]   ;;  %s977_s3 = inlined_call_operand.vmem [shape: f32[8,1], index: 3, kind: input, shape index: {}]   ;;  %s978_s4 = inlined_call_operand.vmem [shape: f32[8,1], index: 4, kind: input, shape index: {}]   ;;  %s979_s5 = inlined_call_operand.vmem [shape: f32[2,8,256], index: 5, kind: output, shape index: {}]  }
   0x1   :  { %s868_s20 = smov 0  }
   0x2 LB: > { %s27_s21 = sadd.s32 1, %s816_s19  ;;  %p744_p0 = scmp.ge.s32.totalorder %s820_s20, 1  ;;  %s820_s20 = sphi %s868_s20, %s15_s20   ;;  %s816_s19 = sphi %s866_s19, %s989_s19   ;;  %s812_s18 = sphi %s864_s18, %s988_s18  }
   0x3   : > { %p29_p1 = scmp.ge.s32.totalorder %s27_s21, 2  ;;  %p222_p2 = scmp.lt.s32.totalorder %s820_s20, 3 }
   0x5   : > { %s991_s21 = smov (%p29_p1, %s27_s21), 0  ;;  %p223_p3 = pnand %p744_p0, %p222_p2 }
   0x6   : > { %p266_p4 = scmp.lt.s32.totalorder (!%p223_p3), %s812_s18, 1  ;;  %s822_s29 = smov (!%p223_p3), 32  }
   0x7   : > { %226 = sbr.rel (%p223_p3) target bundleno = 527 (0x20f), region = 40  ;;  %s823_s30 = smov (!%p223_p3), 16  }
   0x8   : > { %s824_s6 = smov (!%p223_p3), 79   ;;  %s825_s7 = smov (!%p223_p3), 95  }
   0x9   : > { %s826_s8 = smov (!%p223_p3), 81   ;;  %s827_s9 = smov (!%p223_p3), 96  }
   0xa   : > { %s828_s10 = smov (!%p223_p3), 80   ;;  %s829_s11 = smov (!%p223_p3), 97  }
   0xb   : > { %s830_s12 = smov (!%p223_p3), 113   ;;  %s831_s13 = smov (!%p223_p3), 111  }
   0xc   : > { %s993_s18 = smov (!%p266_p4, %s812_s18), 1  ;;  %vm313_vm0 = vcmask 257024   ;;  %vm309_vm1 = vcmask 1043712   ;;  %vm310_vm2 = vcmask 1047556   ;;  %vm320_vm3 = vcmask 388352   ;;  %s832_s14 = smov 112  }
   0xd   : > { %s754_s22 = sshll.u32 %s993_s18, 3  ;;  %vm305_vm4 = vcmask 261120   ;;  %vm298_vm5 = vcmask 257152   ;;  %vm311_vm6 = vmor %vm310_vm2, %vm309_vm1  ;;  %v833_v20 = vmov 0   ;;  %v618_v21 = vld [vmem:[%s977_s3] sm:$0xff]  ;;  %v322_v27 = vlaneseq }
   0xe   : > { %s273_s25 = scalar_lea.vmem %s974_s0, %s754_s22  ;;  %s281_s28 = scalar_lea.vmem %s975_s1, %s754_s22  ;;  %609 = vmatprep.mubr.bf16.mxu0 %v833_v20  ;;  %792 = vset.pattern.permute.xlu0 %v833_v20  ;;  %v626_v22 = vld [vmem:[%s978_s4] sm:$0xff]  ;;  %vm501_vm7 = vcmask 662528   ;;  %vm457_vm10 = vcmask 785408   ;;  %vm522_vm11 = vcmask 654336   ;;  %vm540_vm12 = vcmask 646144  }
   0xf   : > { %v300_v0 = vld [vmem:[%s273_s25] sm:$0xff]  ;;  %793 = vset.pattern.permute.xlu1 %v833_v20  ;;  %v323_v30 = vand.u32 127, %v322_v27  ;;  %vm475_vm15 = vcmask 777216   ;;  %vm431_vm1 = vcmask 793600   ;;  %vm411_vm2 = vcmask 908288   ;;  %s755_s25 = sshll.u32 %s993_s18, 4 }
  0x10   : > { %v315_v1 = vld [vmem:[%s281_s28 + $0x4] sm:$0xf]  ;;  %302 = vrot.lane.b32.xlu0 %v300_v0, %s822_s29  ;;  %v293_v2 = vld [vmem:[%s281_s28] sm:$0xf]  ;;  %s290_s28 = scalar_lea.vmem %s979_s5, %s755_s25 }
  0x11   : > { %317 = vrot.lane.b32.xlu1 %v315_v1, %s822_s29  ;;  %v324_v33 = vadd.s32 128, %v323_v30  ;;  %v329_v36 = vand.u32 15, %v323_v30 }
  0x13   : > { %v336_v37 = vand.u32 15, %v324_v33  ;;  %vm905_vm8 = vcmp.ge.s32.totalorder %v329_v36, 1  ;;  %vm919_vm13 = vcmp.le.s32.totalorder %v329_v36, 14 }
  0x14   : > { %295 = vrot.lane.b32.xlu0 %v293_v2, %s823_s30 }
  0x15   : > { %vm909_vm9 = vcmp.ge.s32.totalorder %v336_v37, 1  ;;  %vm923_vm14 = vcmp.le.s32.totalorder %v336_v37, 14 }
  0x82   : > { %v303_v3 = vpop.permute.xlu0 %302 }
  0x83   : > { %v304_v4 = vrot.slane %v303_v3, 4  ;;  %v318_v5 = vpop.permute.xlu1 %317 }
  0x85   : > { %314 = vst.msk [vmem:[#allocation2 + $0x8] sm:$0xf] %vm313_vm0, %v304_v4  ;;  %v306_v7 = vsel %vm305_vm4, %v304_v4, %v303_v3  ;;  %vm368_vm0 = vcmask 924672   ;;  %vm570_vm4 = vcmask 1041408  }
  0x86   : > { %v296_v6 = vpop.permute.xlu0 %295  ;;  %321 = vst.msk [vmem:[#allocation2 + $0x8] sm:$0xf] %vm320_vm3, %v318_v5  ;;  %vm389_vm3 = vcmask 916480  }
  0x87   : > { %299 = vst.msk [vmem:[#allocation2] sm:$0xf] %vm298_vm5, %v296_v6  ;;  %vm566_vm5 = vcmask 293888  }
  0x88   : > { %312 = vst.msk [vmem:[#allocation2] sm:$0xff] %vm311_vm6, %v306_v7 }
  0x8d   : > { %v530_v9 = vld [vmem:[#allocation2 + $0x8] sm:$0xf] }
  0x8e   : > { %v491_v10 = vld [vmem:[#allocation2 + $0x8] sm:$0xf] }
  0x8f   : > { %v529_v8 = vld [vmem:[#allocation2] sm:$0xff]  ;;  %v465_v11 = vld [vmem:[#allocation2 + $0x8] sm:$0xf] }
  0x90   : > { %534 = vrot.lane.b32.xlu1 %v529_v8, %s824_s6  ;;  %469 = vrot.lane.b32.xlu0 %v529_v8, %s825_s7  ;;  %v447_v12 = vld [vmem:[#allocation2 + $0x8] sm:$0xf]  ;;  %v533_v14 = vcombine.high %v529_v8, %v529_v8  ;;  %v514_v18 = vcombine.low %v529_v8, %v529_v8 }
  0x91   : > { %v421_v13 = vld [vmem:[#allocation2 + $0x8] sm:$0xf] }
  0x92   : > { %v354_v15 = vld [vmem:[#allocation2 + $0x8] sm:$0xf] }
  0x93   : > { %v397_v16 = vld [vmem:[#allocation2 + $0x8] sm:$0xf] }
  0x94   : > { %538 = vrot.lane.b32.xlu1 %v530_v9, %s824_s6  ;;  %499 = vrot.lane.b32.xlu0 %v491_v10, %s826_s8  ;;  %v796_v17 = vld [vmem:[#allocation2 + $0x8] ss:$0 sps:$4 sm:$0xff]  }
  0x95   : > { %v797_v19 = vld [vmem:[#allocation2 + $0x8] ss:$0 sps:$4 sm:$0xff]  }
  0x98   : > { %473 = vrot.lane.b32.xlu1 %v465_v11, %s825_s7  ;;  %455 = vrot.lane.b32.xlu0 %v447_v12, %s827_s9 }
  0x9c   : > { %495 = vrot.lane.b32.xlu1 %v529_v8, %s826_s8  ;;  %518 = vrot.lane.b32.xlu0 %v529_v8, %s828_s10 }
  0xa0   : > { %429 = vrot.lane.b32.xlu1 %v421_v13, %s829_s11  ;;  %451 = vrot.lane.b32.xlu0 %v529_v8, %s827_s9 }
  0xa4   : > { %425 = vrot.lane.b32.xlu0 %v529_v8, %s829_s11  ;;  %362 = vrot.lane.b32.xlu1 %v529_v8, %s830_s12 }
  0xa8   : > { %366 = vrot.lane.b32.xlu0 %v354_v15, %s830_s12  ;;  %497 = vrot.lane.b32.xlu1 %v533_v14, %s826_s8 }
  0xac   : > { %409 = vrot.lane.b32.xlu0 %v397_v16, %s831_s13  ;;  %453 = vrot.lane.b32.xlu1 %v533_v14, %s827_s9 }
  0xb0   : > { %385 = vrot.lane.b32.xlu0 %v529_v8, %s832_s14  ;;  %520 = vrot.lane.b32.xlu1 %v796_v17, %s828_s10 }
  0xb4   : > { %536 = vrot.lane.b32.xlu0 %v533_v14, %s824_s6  ;;  %516 = vrot.lane.b32.xlu1 %v514_v18, %s828_s10 }
  0xb8   : > { %471 = vrot.lane.b32.xlu0 %v533_v14, %s825_s7  ;;  %364 = vrot.lane.b32.xlu1 %v533_v14, %s830_s12 }
  0xbc   : > { %427 = vrot.lane.b32.xlu0 %v533_v14, %s829_s11  ;;  %407 = vrot.lane.b32.xlu1 %v533_v14, %s831_s13 }
  0xc0   : > { %405 = vrot.lane.b32.xlu0 %v529_v8, %s831_s13  ;;  %387 = vrot.lane.b32.xlu1 %v797_v19, %s832_s14 }
  0xc4   : > { %383 = vrot.lane.b32.xlu1 %v514_v18, %s832_s14  ;;  %621 = vperm.xlu0 %792, %v618_v21  }
  0xc8   : > { %629 = vperm.xlu1 %793, %v626_v22  }
 0x102   : > { %v535_v23 = vpop.permute.xlu1 %534  ;;  %v470_v24 = vpop.permute.xlu0 %469 }
 0x106   : > { %v539_v25 = vpop.permute.xlu1 %538  ;;  %v500_v26 = vpop.permute.xlu0 %499 }
 0x10a   : > { %v474_v28 = vpop.permute.xlu1 %473  ;;  %v456_v29 = vpop.permute.xlu0 %455 }
 0x10e   : > { %v496_v31 = vpop.permute.xlu1 %495  ;;  %v519_v32 = vpop.permute.xlu0 %518 }
 0x112   : > { %v903_v34 = vpop.permute.xlu1 %429  ;;  %v452_v35 = vpop.permute.xlu0 %451 }
 0x116   : > { %v426_v38 = vpop.permute.xlu0 %425  ;;  %v363_v39 = vpop.permute.xlu1 %362 }
 0x11a   : > { %v367_v42 = vpop.permute.xlu0 %366  ;;  %v498_v43 = vpop.permute.xlu1 %497 }
 0x11b   : > { %v502_v44 = vsel %vm501_vm7, %v496_v31, %v498_v43  ;;  %v503_v45 = vsel %vm501_vm7, %v498_v43, %v500_v26 }
 0x11c   : > { %v506_v46 = vsel %vm905_vm8, %v502_v44, 0.0  ;;  %v507_v47 = vsel %vm909_vm9, %v503_v45, 0.0 }
 0x11d   : > { %508 = vst [vmem:[#allocation3 + $0x8] sm:$0xf] %v506_v46  ;;  %509 = vst [vmem:[#allocation3 + $0x20] sm:$0xf] %v507_v47  ;;  %v565_v46 = vld [vmem:[%s976_s2] sm:$0xf] }
 0x11e   : > { %v410_v48 = vpop.permute.xlu0 %409  ;;  %v454_v49 = vpop.permute.xlu1 %453 }
 0x11f   : > { %v458_v50 = vsel %vm457_vm10, %v452_v35, %v454_v49  ;;  %v459_v51 = vsel %vm457_vm10, %v454_v49, %v456_v29 }
 0x120   : > { %462 = vst [vmem:[#allocation3 + $0x48] sm:$0xf] %v458_v50  ;;  %463 = vst [vmem:[#allocation3 + $0x28] sm:$0xf] %v459_v51 }
 0x122   : > { %v917_v52 = vpop.permute.xlu0 %385  ;;  %v521_v53 = vpop.permute.xlu1 %520 }
 0x123   : > { %v524_v54 = vsel %vm522_vm11, %v519_v32, %v521_v53 }
 0x124   : > { %528 = vst [vmem:[#allocation3 + $0x20] sm:$0xf0] %v524_v54 }
 0x126   : > { %v537_v57 = vpop.permute.xlu0 %536  ;;  %v517_v58 = vpop.permute.xlu1 %516 }
 0x127   : > { %v541_v59 = vsel %vm540_vm12, %v535_v23, %v537_v57  ;;  %v542_v60 = vsel %vm540_vm12, %v537_v57, %v539_v25  ;;  %v523_v61 = vsel %vm522_vm11, %v517_v58, %v519_v32 }
 0x128   : > { %v545_v62 = vsel %vm919_vm13, %v541_v59, 0.0  ;;  %v546_v63 = vsel %vm923_vm14, %v542_v60, 0.0  ;;  %527 = vst [vmem:[#allocation3 + $0x8] sm:$0xf0] %v523_v61 }
 0x129   : > { %547 = vst [vmem:[#allocation3 + $0x40] sm:$0xf] %v545_v62  ;;  %548 = vst [vmem:[#allocation3 + $0x38] sm:$0xf] %v546_v63 }
 0x12a   : > { %v472_v0 = vpop.permute.xlu0 %471  ;;  %v365_v1 = vpop.permute.xlu1 %364 }
 0x12b   : > { %v476_v2 = vsel %vm475_vm15, %v470_v24, %v472_v0  ;;  %v477_v3 = vsel %vm475_vm15, %v472_v0, %v474_v28  ;;  %v369_v4 = vsel %vm368_vm0, %v363_v39, %v365_v1  ;;  %v370_v5 = vsel %vm368_vm0, %v365_v1, %v367_v42  ;;  %v556_v32 = vld [vmem:[#allocation3 + $0x20] sm:$0xff] }
 0x12c   : > { %v480_v6 = vsel %vm919_vm13, %v476_v2, 0.0  ;;  %v481_v7 = vsel %vm923_vm14, %v477_v3, 0.0  ;;  %v373_v8 = vsel %vm905_vm8, %v369_v4, 0.0  ;;  %v374_v9 = vsel %vm909_vm9, %v370_v5, 0.0 }
 0x12d   : > { %v484_v10 = vrot.slane %v480_v6, 4  ;;  %v485_v11 = vrot.slane %v481_v7, 4  ;;  %375 = vst [vmem:[#allocation3 + $0x30] sm:$0xf] %v373_v8  ;;  %376 = vst [vmem:[#allocation3] sm:$0xf] %v374_v9 }
 0x12e   : > { %v428_v12 = vpop.permute.xlu0 %427  ;;  %v408_v13 = vpop.permute.xlu1 %407 }
 0x12f   : > { %488 = vst [vmem:[#allocation3 + $0x48] sm:$0xf0] %v484_v10  ;;  %489 = vst [vmem:[#allocation3 + $0x28] sm:$0xf0] %v485_v11  ;;  %v432_v14 = vsel %vm431_vm1, %v426_v38, %v428_v12  ;;  %v433_v15 = vsel %vm431_vm1, %v428_v12, %v903_v34  ;;  %v413_v16 = vsel %vm411_vm2, %v408_v13, %v410_v48  ;;  %v555_v36 = vld [vmem:[#allocation3 + $0x8] sm:$0xff] }
 0x130   : > { %v436_v17 = vsel %vm905_vm8, %v432_v14, 0.0  ;;  %v437_v18 = vsel %vm909_vm9, %v433_v15, 0.0  ;;  %v417_v19 = vsel %vm923_vm14, %v413_v16, 0.0  ;;  %v558_v20 = vld [vmem:[#allocation3 + $0x38] sm:$0xf] }
 0x131   : > { %v440_v21 = vrot.slane %v436_v17, 4  ;;  %v441_v22 = vrot.slane %v437_v18, 4  ;;  %419 = vst [vmem:[#allocation3 + $0x10] sm:$0xf] %v417_v19  ;;  %v564_v23 = vpack.c.bf16 %v558_v20, %v558_v20  ;;  %v557_v24 = vld [vmem:[#allocation3 + $0x40] sm:$0xf] }
 0x132   : > { %v406_v25 = vpop.permute.xlu0 %405  ;;  %v388_v26 = vpop.permute.xlu1 %387  ;;  %v563_v27 = vpack.c.bf16 %v557_v24, %v557_v24 }
 0x133   : > { %444 = vst [vmem:[#allocation3 + $0x18] sm:$0xf0] %v440_v21  ;;  %445 = vst [vmem:[#allocation3 + $0x10] sm:$0xf0] %v441_v22  ;;  %v412_v28 = vsel %vm411_vm2, %v406_v25, %v408_v13  ;;  %v391_v29 = vsel %vm389_vm3, %v917_v52, %v388_v26  ;;  %750 = vmatprep.subr.msk.bf16.mxu0 %vm570_vm4, %v564_v23 }
 0x134   : > { %v416_v30 = vsel %vm919_vm13, %v412_v28, 0.0  ;;  %395 = vst [vmem:[#allocation3] sm:$0xf0] %v391_v29  ;;  %v572_v31 = vsel %vm570_vm4, %v563_v27, 0 }
 0x135   : > { %418 = vst [vmem:[#allocation3 + $0x18] sm:$0xf] %v416_v30  ;;  %588 = vmatpush1.bf16.msra.mxu0 %v572_v31 }
 0x136   : > { %v384_v33 = vpop.permute.xlu1 %383  ;;  %v554_v34 = vld [vmem:[#allocation3 + $0x28] sm:$0xff] }
 0x137   : > { %v553_v35 = vld [vmem:[#allocation3 + $0x48] sm:$0xff]  ;;  %v390_v37 = vsel %vm389_vm3, %v384_v33, %v917_v52  ;;  %v562_v38 = vpack.c.bf16 %v556_v32, %v554_v34 }
 0x138   : > { %v561_v39 = vpack.c.bf16 %v555_v36, %v553_v35  ;;  %394 = vst [vmem:[#allocation3 + $0x30] sm:$0xf0] %v390_v37 }
 0x139   : > { %589 = vmatprep.subr.bf16.mxu0 %v562_v38 }
 0x13a   : > { %590 = vmatpush1.bf16.msra.mxu0 %v561_v39  ;;  %v552_v40 = vld [vmem:[#allocation3 + $0x10] sm:$0xff] }
 0x13b   : > { %v550_v41 = vld [vmem:[#allocation3] sm:$0xff] }
 0x13c   : > { %v560_v42 = vpack.c.bf16 %v552_v40, %v550_v41  ;;  %v551_v44 = vld [vmem:[#allocation3 + $0x18] sm:$0xff] }
 0x13e   : > { %591 = vmatprep.subr.bf16.mxu0 %v560_v42 }
 0x13f   : > { %v549_v43 = vld [vmem:[#allocation3 + $0x30] sm:$0xff]  ;;  %v622_v47 = vpop.permute.xlu0 %621 }
 0x140   : > { %v559_v45 = vpack.c.bf16 %v551_v44, %v549_v43 }
 0x142   : > { %592 = vmatpush1.bf16.msra.mxu0 %v559_v45 }
 0x143   : > { %v630_v49 = vpop.permute.xlu1 %629 }
 0x145   : > { %751 = vmatmul.mubr.msk.bf16.vlgmr.msra.gmra.mxu0 %vm566_vm5, %v565_v46 }
 0x205   : > { %v611_v48 = vpop.f32.mrf.mxu0 }
 0x206   : > { %v624_v50 = vmul.f32 %v622_v47, %v611_v48 }
 0x207   : > { %v613_v51 = vpop.f32.mrf.mxu0 }
 0x208   : > { %v625_v52 = vmul.f32 %v622_v47, %v613_v51  ;;  %v632_v53 = vadd.f32 %v630_v49, %v624_v50 }
 0x209   : > { %v615_v54 = vpop.f32.mrf.mxu0 }
 0x20a   : > { %v633_v55 = vadd.f32 %v630_v49, %v625_v52  ;;  %v634_v56 = vmax.f32 %v632_v53, 0.0 }
 0x20b   : > { %v616_v57 = vpop.f32.mrf.mxu0 }
 0x20c   : > { %v635_v58 = vmax.f32 %v633_v55, 0.0  ;;  %636 = vst [vmem:[%s290_s28] sm:$0xff] %v634_v56 }
 0x20e   : > { %637 = vst [vmem:[%s290_s28 + $0x8] sm:$0xff] %v635_v58 }
 0x20f PF: > { %s15_s20 = sadd.s32 1, %s820_s20   ;;  %s988_s18 = smov %s816_s19 }
 0x210   : > { %p12_p5 = scmp.ge.s32.totalorder %s15_s20, 4   ;;  %s989_s19 = smov %s991_s21 }
 0x212   :  { %14 = sbr.rel (!%p12_p5) target bundleno = 2 (0x2), region = 73 }

</bundles_post_ra>
